<compile_context>
chip_gen: v7x
topology: tpu7x:2x2x1
jax: 0.10.0
libtpu: 0.0.40
codegen_flags: <defaults>
</compile_context>

<pallas_src>
import functools

import jax
import jax.numpy as jnp
from jax.experimental import pallas as pl
from jax.experimental.pallas import tpu as pltpu


def _round_up(x, m):
    return (x + m - 1) // m * m


def _partition_loss_kernel(x_ref, out_ref, acc_ref, *, total_b):
    i = pl.program_id(0)
    n = pl.num_programs(0)

    @pl.when(i == 0)
    def _():
        acc_ref[0] = jnp.float32(0.0)

    x = x_ref[...].astype(jnp.float32)            # (TB, H, C)
    tb, num_head, c = x.shape

    # Two-pass unbiased variance over the head axis (torch.var default).
    mean = jnp.mean(x, axis=1, keepdims=True)     # (TB, 1, C)
    diff = x - mean
    var = jnp.sum(diff * diff, axis=1) * (1.0 / (num_head - 1))   # (TB, C)

    # Mask padded batch rows of the last (partial) tile.
    row_ids = i * tb + jax.lax.broadcasted_iota(jnp.int32, (tb, c), 0)
    var = jnp.where(row_ids < total_b, var, 0.0)

    acc_ref[0] += jnp.sum(var)

    @pl.when(i == n - 1)
    def _():
        var_mean = acc_ref[0] / jnp.float32(total_b * c)
        out_ref[0, 0] = jnp.log(1.0 + jnp.float32(num_head) / var_mean)


def partition_loss(x, *, max_block_bytes=4 * 1024 * 1024):
    """x: (B, H, C) array (heads on axis 1). Returns scalar float32 loss."""
    B, H, C = x.shape
    if H <= 1:
        # PyTorch module returns 0 for a single head.
        return jnp.float32(0.0)

    # Per-batch-row VMEM footprint: the (H, C) minor slab pads to (8, 128) tiles.
    row_bytes = _round_up(H, 8) * _round_up(C, 128) * 4
    tb = int(max(1, min(B, max_block_bytes // row_bytes)))
    grid = (pl.cdiv(B, tb),)

    kernel = functools.partial(_partition_loss_kernel, total_b=B)

    cost = pl.CostEstimate(
        flops=3 * B * H * C,
        transcendentals=1,
        bytes_accessed=B * H * C * x.dtype.itemsize,
    )

    out = pl.pallas_call(
        kernel,
        out_shape=jax.ShapeDtypeStruct((1, 1), jnp.float32),
        grid_spec=pltpu.PrefetchScalarGridSpec(
            num_scalar_prefetch=0,
            grid=grid,
            in_specs=[pl.BlockSpec((tb, H, C), lambda i: (i, 0, 0))],
            out_specs=pl.BlockSpec(memory_space=pltpu.MemorySpace.SMEM),
            scratch_shapes=[pltpu.SMEM((1,), jnp.float32)],
        ),
        compiler_params=pltpu.CompilerParams(
            dimension_semantics=("arbitrary",),
            vmem_limit_bytes=32 * 1024 * 1024,
        ),
        cost_estimate=cost,
    )(x)
    return out[0, 0]


def _reference_loss(x):
    H = x.shape[1]
    mean = jnp.mean(x, axis=1, keepdims=True)
    var = jnp.sum((x - mean) ** 2, axis=1) / (H - 1)
    return jnp.log(1.0 + H / jnp.mean(var))


if __name__ == "__main__":
    key = jax.random.PRNGKey(0)

    # Small shape consistent with the module: batch=2, num_head=4, channels=32.
    x = jax.random.normal(key, (2, 4, 32), dtype=jnp.float32)
    loss = jax.block_until_ready(partition_loss(x))
    loss_ref = _reference_loss(x)
    assert jnp.allclose(loss, loss_ref, rtol=1e-5, atol=1e-6), (loss, loss_ref)

    # Exercise the multi-tile + partial-last-tile (masking) path:
    # max_block_bytes forces TB=2 so B=5 -> grid of 3 with one padded row.
    x2 = jax.random.normal(jax.random.PRNGKey(1), (5, 4, 32), dtype=jnp.float32)
    loss2 = jax.block_until_ready(partition_loss(x2, max_block_bytes=8192))
    loss2_ref = _reference_loss(x2)
    assert jnp.allclose(loss2, loss2_ref, rtol=1e-5, atol=1e-6), (loss2, loss2_ref)

    # Single-head case returns 0 (matches PyTorch module).
    x3 = jax.random.normal(jax.random.PRNGKey(2), (2, 1, 32), dtype=jnp.float32)
    assert float(partition_loss(x3)) == 0.0

    print("KERNEL_OK")
</pallas_src>

<mosaic_0001>
module attributes {stable_mosaic.version = 11 : i64} {
  func.func @_partition_loss_kernel(%arg0: i32, %arg1: memref<2x4x32xf32, #tpu.memory_space<vmem>>, %arg2: memref<1x1xf32, #tpu.memory_space<smem>>, %arg3: memref<1xf32, #tpu.memory_space<smem>>) attributes {dimension_semantics = [#tpu.dimension_semantics<arbitrary>], iteration_bounds = array<i64: 1>, scalar_prefetch = 0 : i64, scratch_operands = 1 : i64, tpu.core_type = #tpu.core_type<tc>, window_params = [{transform_indices = @transform_0, window_bounds = array<i64: 2, 4, 32>}, {transform_indices = @transform_1, window_bounds = array<i64: 1, 1>}]} {
    %c0_i32 = arith.constant 0 : i32
    %0 = arith.cmpi eq, %arg0, %c0_i32 : i32
    %1 = arith.extui %0 : i1 to i32
    %c0_i32_0 = arith.constant 0 : i32
    %2 = arith.cmpi ne, %1, %c0_i32_0 : i32
    scf.if %2 {
      %cst_13 = arith.constant 0.000000e+00 : f32
      %c0_14 = arith.constant 0 : index
      %32 = memref.load %arg3[%c0_14] : memref<1xf32, #tpu.memory_space<smem>>
      memref.store %cst_13, %arg3[%c0_14] : memref<1xf32, #tpu.memory_space<smem>>
    } else {
    }
    %c0 = arith.constant 0 : index
    %c0_1 = arith.constant 0 : index
    %c0_2 = arith.constant 0 : index
    %3 = vector.load %arg1[%c0, %c0_1, %c0_2] : memref<2x4x32xf32, #tpu.memory_space<vmem>>, vector<2x4x32xf32>
    %cst = arith.constant dense<0.000000e+00> : vector<2x32xf32>
    %4 = vector.multi_reduction <add>, %3, %cst [1] : vector<2x4x32xf32> to vector<2x32xf32>
    %5 = vector.shape_cast %4 : vector<2x32xf32> to vector<2x1x32xf32>
    %cst_3 = arith.constant 4.000000e+00 : f32
    %6 = vector.broadcast %cst_3 : f32 to vector<2x1x32xf32>
    %7 = arith.divf %5, %6 : vector<2x1x32xf32>
    %8 = vector.broadcast %7 : vector<2x1x32xf32> to vector<2x4x32xf32>
    %9 = arith.subf %3, %8 : vector<2x4x32xf32>
    %10 = arith.mulf %9, %9 : vector<2x4x32xf32>
    %cst_4 = arith.constant dense<0.000000e+00> : vector<2x32xf32>
    %11 = vector.multi_reduction <add>, %10, %cst_4 [1] : vector<2x4x32xf32> to vector<2x32xf32>
    %cst_5 = arith.constant 0.333333343 : f32
    %12 = vector.broadcast %cst_5 : f32 to vector<2x32xf32>
    %13 = arith.mulf %11, %12 : vector<2x32xf32>
    %c2_i32 = arith.constant 2 : i32
    %14 = arith.muli %arg0, %c2_i32 : i32
    %15 = tpu.iota {dimensions = array<i32: 0>} : vector<2x32xi32>
    %16 = vector.broadcast %14 : i32 to vector<2x32xi32>
    %17 = arith.addi %16, %15 : vector<2x32xi32>
    %c2_i32_6 = arith.constant 2 : i32
    %18 = vector.broadcast %c2_i32_6 : i32 to vector<2x32xi32>
    %19 = arith.cmpi slt, %17, %18 : vector<2x32xi32>
    %cst_7 = arith.constant 0.000000e+00 : f32
    %20 = vector.broadcast %cst_7 : f32 to vector<2x32xf32>
    %21 = arith.select %19, %13, %20 : vector<2x32xi1>, vector<2x32xf32>
    %c0_8 = arith.constant 0 : index
    %22 = memref.load %arg3[%c0_8] : memref<1xf32, #tpu.memory_space<smem>>
    %23 = vector.shape_cast %21 : vector<2x32xf32> to vector<1x2x32xf32>
    %cst_9 = arith.constant dense<0.000000e+00> : vector<1xf32>
    %24 = vector.multi_reduction <add>, %23, %cst_9 [1, 2] : vector<1x2x32xf32> to vector<1xf32>
    %25 = vector.shape_cast %24 : vector<1xf32> to vector<1x1x1xf32>
    %26 = vector.extract %25[0, 0, 0] : f32 from vector<1x1x1xf32>
    %27 = arith.addf %22, %26 : f32
    %c0_10 = arith.constant 0 : index
    %28 = memref.load %arg3[%c0_10] : memref<1xf32, #tpu.memory_space<smem>>
    memref.store %27, %arg3[%c0_10] : memref<1xf32, #tpu.memory_space<smem>>
    %c0_i32_11 = arith.constant 0 : i32
    %29 = arith.cmpi eq, %arg0, %c0_i32_11 : i32
    %30 = arith.extui %29 : i1 to i32
    %c0_i32_12 = arith.constant 0 : i32
    %31 = arith.cmpi ne, %30, %c0_i32_12 : i32
    scf.if %31 {
      %c0_13 = arith.constant 0 : index
      %32 = memref.load %arg3[%c0_13] : memref<1xf32, #tpu.memory_space<smem>>
      %cst_14 = arith.constant 6.400000e+01 : f32
      %33 = arith.divf %32, %cst_14 : f32
      %cst_15 = arith.constant 4.000000e+00 : f32
      %34 = arith.divf %cst_15, %33 : f32
      %cst_16 = arith.constant 1.000000e+00 : f32
      %35 = arith.addf %cst_16, %34 : f32
      %36 = math.log %35 : f32
      %c0_17 = arith.constant 0 : index
      %c0_18 = arith.constant 0 : index
      %37 = memref.load %arg2[%c0_17, %c0_18] : memref<1x1xf32, #tpu.memory_space<smem>>
      memref.store %36, %arg2[%c0_17, %c0_18] : memref<1x1xf32, #tpu.memory_space<smem>>
    } else {
    }
    return
  }
  func.func @transform_0(%arg0: i32) -> (i32, i32, i32) {
    %c0_i32 = arith.constant 0 : i32
    %c0_i32_0 = arith.constant 0 : i32
    %c0_i32_1 = arith.constant 0 : i32
    return %arg0, %c0_i32, %c0_i32_0 : i32, i32, i32
  }
  func.func @transform_1(%arg0: i32) -> (i32, i32) {
    %c0_i32 = arith.constant 0 : i32
    %c0_i32_0 = arith.constant 0 : i32
    %c0_i32_1 = arith.constant 0 : i32
    return %c0_i32, %c0_i32_0 : i32, i32
  }
}

</mosaic_0001>

<bundles_post_ra>
// kernel: tpu_custom_call.1
= control target key start
LH: loop header
LB: loop body
LE: loop exit
PB: predicated region body
PF: predicated region fallthrough
CT: control target
= control target key end

     0   :  { %6 = vsyncpa [#allocation4], 0  ;;  %s220_s0 = inlined_call_operand.hbm [shape: f32[2,4,32], index: 0, kind: input, shape index: {}]   ;;  %s221_s1 = inlined_call_operand.hbm [shape: f32[1,1], index: 1, kind: output, shape index: {}]  }
   0x1   :  { %7 = vsyncpa [#allocation5], 0  ;;  %s178_s6 = smov [#allocation3]   ;;  %s142_s10 = scalar_lea.hbm %s220_s0, 128 }
   0x2   :  { %s13_s7 = sshll.u32 %s178_s6, 4  ;;  %p143_p0 = scmp.ne.s32.totalorder %s220_s0, %s142_s10  ;;  %s14_s7 = int_to_ptr.vmem [resolvable:$true] %s13_s7 }
   0x3   :  { %p146_p1 = scmp.lt.u32.totalorder %s142_s10, %s220_s0 }
   0x5   :  { %p148_p2 = pnand %p146_p1, %p143_p0 }
   0x7   :  { %151 = shalt.err (!%p148_p2)
}
   0x8   :  { %s152_s15 = scalar_lea.vmem %s14_s7, 128  ;;  %p157_p4 = scmp.lt.s32.totalorder %s14_s7, %s14_s7 }
   0x9   :  { %p153_p3 = scmp.ne.s32.totalorder %s14_s7, %s152_s15  ;;  %p158_p5 = scmp.lt.s32.totalorder %s152_s15, %s152_s15 }
   0xb   :  { %p159_p6 = por %p158_p5, %p157_p4 }
   0xd   :  { %p160_p7 = pnand %p159_p6, %p153_p3 }
   0xf   :  { %163 = shalt.err (!%p160_p7)
}
  0x10   :  { %s179_s16 = smov 64   ;;  %s180_s17 = smov 4  }
  0x11   :  { %19 = dma.hbm_to_vmem [thread:$0]  %s220_s0, 128, %s14_s7, [#allocation4], %s179_s16, %s179_s16, %s180_s17  }
  0x12   :  { %174 = dma.done.wait [#allocation4], 128  }
  0x13   :  { %175 = vsyncadd [#allocation4], 4294967168  ;;  %vm31_vm0 = vcmask 257024   ;;  %v29_v0 = vld [vmem:[#allocation3] sm:$0xf]  ;;  %v70_v30 = vlaneseq  ;;  %vm77_vm1 = vcmask 1041409  }
  0x14   :  { %v30_v1 = vld [vmem:[#allocation3 + $0x4] sm:$0xf]  ;;  %v32_v2 = vsel %vm31_vm0, %v29_v0, 0.0  ;;  %vm82_vm3 = vcmask 254976   ;;  %s164_s27 = scalar_lea.hbm %s221_s1, 16 }
  0x15   :  { %v39_v3 = vsel %vm31_vm0, %v30_v1, 0.0  ;;  %v33_v4 = vrot.slane %v32_v2, 4  ;;  %v71_v35 = vshrl.u32 %v70_v30, 7  ;;  %p165_p8 = scmp.ne.s32.totalorder %s221_s1, %s164_s27  ;;  %p168_p9 = scmp.lt.u32.totalorder %s164_s27, %s221_s1 }
  0x16   :  { %v40_v5 = vrot.slane %v39_v3, 4 }
  0x17   :  { %v34_v6 = vadd.f32 %v33_v4, %v32_v2  ;;  %vm74_vm2 = vcmp.lt.s32.totalorder %v71_v35, 2  ;;  %p170_p10 = pnand %p168_p9, %p165_p8 }
  0x18   :  { %v41_v7 = vadd.f32 %v40_v5, %v39_v3 }
  0x19   :  { %v35_v8 = vrot.slane %v34_v6, 2 }
  0x1a   :  { %v42_v9 = vrot.slane %v41_v7, 2 }
  0x1b   :  { %v36_v10 = vadd.f32 %v35_v8, %v34_v6 }
  0x1c   :  { %v43_v11 = vadd.f32 %v42_v9, %v41_v7 }
  0x1d   :  { %v37_v12 = vrot.slane %v36_v10, 1 }
  0x1e   :  { %v44_v13 = vrot.slane %v43_v11, 1 }
  0x1f   :  { %v38_v14 = vadd.f32 %v37_v12, %v36_v10 }
  0x20   :  { %v45_v15 = vadd.f32 %v44_v13, %v43_v11 }
  0x21   :  { %v47_v16 = vmul.f32 0.25, %v38_v14 }
  0x22   :  { %v48_v17 = vmul.f32 0.25, %v45_v15 }
  0x23   :  { %v49_v18 = vsub.f32 %v29_v0, %v47_v16 }
  0x24   :  { %v50_v19 = vsub.f32 %v30_v1, %v48_v17 }
  0x25   :  { %v51_v20 = vmul.f32 %v49_v18, %v49_v18 }
  0x26   :  { %v52_v21 = vmul.f32 %v50_v19, %v50_v19 }
  0x27   :  { %v53_v22 = vsel %vm31_vm0, %v51_v20, 0.0 }
  0x28   :  { %v60_v23 = vsel %vm31_vm0, %v52_v21, 0.0  ;;  %v54_v24 = vrot.slane %v53_v22, 4 }
  0x29   :  { %v61_v25 = vrot.slane %v60_v23, 4 }
  0x2a   :  { %v55_v26 = vadd.f32 %v54_v24, %v53_v22 }
  0x2b   :  { %v62_v27 = vadd.f32 %v61_v25, %v60_v23 }
  0x2c   :  { %v56_v28 = vrot.slane %v55_v26, 2 }
  0x2d   :  { %v63_v29 = vrot.slane %v62_v27, 2 }
  0x2e   :  { %v57_v31 = vadd.f32 %v56_v28, %v55_v26 }
  0x2f   :  { %v64_v32 = vadd.f32 %v63_v29, %v62_v27 }
  0x30   :  { %v58_v33 = vrot.slane %v57_v31, 1 }
  0x31   :  { %v65_v34 = vrot.slane %v64_v32, 1 }
  0x32   :  { %v59_v36 = vadd.f32 %v58_v33, %v57_v31 }
  0x33   :  { %v66_v37 = vadd.f32 %v65_v34, %v64_v32 }
  0x34   :  { %v67_v38 = vmul.f32 0.33333334, %v59_v36 }
  0x35   :  { %v68_v39 = vmul.f32 0.33333334, %v66_v37 }
  0x37   :  { %v78_v40 = vsel %vm77_vm1, %v68_v39, %v67_v38 }
  0x38   :  { %v80_v41 = vsel %vm74_vm2, %v78_v40, 0.0 }
  0x39   :  { %v83_v42 = vsel %vm82_vm3, %v80_v41, 0.0 }
  0x3a   :  { %84 = vadd.xlane.f32.xlu0 %v83_v42 }
  0xc7   :  { %v85_v43 = vpop.xlane.xlu0 %84 }
  0xc8   :  { %v86_v44 = vrot.slane %v85_v43, 4 }
  0xca   :  { %v87_v45 = vadd.f32 %v86_v44, %v85_v43 }
  0xcc   :  { %v88_v46 = vrot.slane %v87_v45, 2 }
  0xce   :  { %v89_v47 = vadd.f32 %v88_v46, %v87_v45 }
  0xd0   :  { %v90_v48 = vrot.slane %v89_v47, 1 }
  0xd2   :  { %v91_v49 = vadd.f32 %v90_v48, %v89_v47 }
  0xd4   :  { %128 = vpush %v91_v49 }
 0x105   :  { %s129_s0 = spop %128 }
 0x106   :  { %s102_s20 = smul.f32 0.015625, %s129_s0 }
 0x108   :  { %v103_v50 = vstv %s102_s20 }
 0x109   :  { %138 = vrcp.f32 %v103_v50 }
 0x113   :  { %v139_v51 = vpop.eup %138 }
 0x114   :  { %130 = vpush %v139_v51 }
 0x145   :  { %s131_s21 = spop %130 }
 0x146   :  { %s106_s22 = smul.f32 4.0, %s131_s21 }
 0x148   :  { %s107_s23 = sadd.f32 1.0, %s106_s22 }
 0x14a   :  { %v108_v52 = vstv %s107_s23 }
 0x14b   :  { %140 = vlog2.f32 %v108_v52 }
 0x155   :  { %v141_v53 = vpop.eup %140 }
 0x156   :  { %v110_v54 = vmul.f32 0.6931472, %v141_v53 }
 0x158   :  { %132 = vpush %v110_v54 }
 0x189   :  { %s133_s24 = spop %132 }
 0x18a   :  { %113 = sst [smem:[#allocation6]] %s133_s24 }
 0x18b   :  { %173 = shalt.err (!%p170_p10)
}
 0x18c   :  { %s181_s3 = smov [#allocation6]  }
 0x18d   :  { %121 = dma.smem_to_hbm %s181_s3, 16, %s221_s1, [#allocation5]  }
 0x18e   :  { %176 = dma.done.wait [#allocation5], 16  }
 0x18f   :  { %177 = vsyncadd [#allocation5], 4294967280 }
 0x190   :  { %125 = sfence }
 0x191   :  { %126 = vsyncpa [#allocation4], 1 }
 0x192   :  { %127 = vsyncpa [#allocation5], 1 }

</bundles_post_ra>
